<compile_context>
chip_gen: v7x
topology: tpu7x:2x2x1
jax: 0.10.0
libtpu: 0.0.40
codegen_flags: <defaults>
</compile_context>

<pallas_src>
import functools

import jax
import jax.numpy as jnp
from jax.experimental import pallas as pl
from jax.experimental.pallas import tpu as pltpu


# ----------------------------- fused BiLSTM kernel ---------------------------
def _bilstm_kernel(x2_ref, wx_ref, whh_ref, b_ref, ew_ref, eb_ref,
                   out_ref, gx_scr, *, Bp):
    """Fused bidirectional LSTM + output Linear, single invocation.

    x2_ref  : (T*Bp, 2*nIn)  rows = [x[t] | x[T-1-t]] per (time, padded-batch)
    wx_ref  : (2*nIn, 8H)    rows [0:nIn] feed fwd columns only, rows [nIn:2nIn] bwd only
                             (columns gate-major: [i_f,i_b,f_f,f_b,g_f,g_b,o_f,o_b])
    whh_ref : (2H, 8H)       hidden->gate weights, block structured over h = [h_fwd|h_bwd]
    b_ref   : (1, 8H)        combined bias (b_ih + b_hh), same column layout
    ew_ref  : (2H, Np)       embedding weight (transposed, lane-padded), rows [h_fwd|h_bwd]
    eb_ref  : (1, Np)        embedding bias (lane-padded)
    out_ref : (T*Bp, Np)
    gx_scr  : (T*Bp, 8H)     scratch: pre-blended input->gate contributions (+bias)
    """
    TB = x2_ref.shape[0]
    T = TB // Bp
    H2 = whh_ref.shape[0]          # 2H
    H = H2 // 2

    # (1) Input->gate contributions for every timestep & both directions (+bias) in one big
    #     MXU matmul.  The backward direction's time reversal is already folded in via the
    #     [x | x_rev] input and the block-zero weight, so nothing is blended inside the loop.
    gx_scr[...] = (
        jnp.dot(x2_ref[...], wx_ref[...], preferred_element_type=jnp.float32)
        + b_ref[...]
    )

    whh = whh_ref[...]             # (2H, 8H) resident across the whole recurrence

    # Lane masks, computed once, off the recurrence path.
    go_is_g = jax.lax.broadcasted_iota(jnp.int32, (Bp, 2 * H2), 1) < H2   # g vs o lanes
    is_fwd = jax.lax.broadcasted_iota(jnp.int32, (Bp, H2), 1) < H         # h_fwd vs h_bwd

    h = jnp.zeros((Bp, H2), jnp.float32)     # [h_fwd | h_bwd]
    c = jnp.zeros((Bp, H2), jnp.float32)     # [c_fwd | c_bwd]

    hs = []
    # (2) Recurrence, fully unrolled (T is a small static constant): step s advances the
    #     forward LSTM at time s and the backward LSTM at time T-1-s.
    # TODO(synk): for T >~ 32 switch to lax.fori_loop(..., unroll=k) + a VMEM hidden-seq
    #             scratch to bound vreg live ranges and code size.
    for s in range(T):
        r = s * Bp                                               # 8-sublane-aligned block
        gates = gx_scr[r:r + Bp, :] + jnp.dot(h, whh, preferred_element_type=jnp.float32)

        if_act = jax.nn.sigmoid(gates[:, :2 * H2])               # [i_f,i_b,f_f,f_b] full vreg
        go_raw = gates[:, 2 * H2:]                               # [g_f,g_b,o_f,o_b]
        go_act = jnp.where(go_is_g, jnp.tanh(go_raw), jax.nn.sigmoid(go_raw))

        i_g = if_act[:, :H2]
        f_g = if_act[:, H2:]
        g_g = go_act[:, :H2]
        o_g = go_act[:, H2:]

        c = f_g * c + i_g * g_g
        h = o_g * jnp.tanh(c)
        hs.append(h)                                             # stays in vregs

    # (3) Reassemble the time-ordered hidden sequence: output time t takes h_fwd from step t
    #     and h_bwd from step T-1-t.  Full-width selects, no lane slicing, off the serial path.
    hseq = jnp.concatenate(
        [jnp.where(is_fwd, hs[t], hs[T - 1 - t]) for t in range(T)], axis=0)  # (T*Bp, 2H)

    # (4) Fused embedding Linear epilogue; single lane-dense (Np multiple of 128) store.
    out_ref[...] = (
        jnp.dot(hseq, ew_ref[...], preferred_element_type=jnp.float32)
        + eb_ref[...]
    )


# ----------------------------- weight packing --------------------------------
def _pack_gate_cols(w_f, w_b):
    """(4H, K) PyTorch-layout weights for both directions -> (K, 8H), columns ordered
    gate-major / direction-interleaved: [i_f, i_b, f_f, f_b, g_f, g_b, o_f, o_b]."""
    H4, K = w_f.shape
    H = H4 // 4
    w = jnp.stack([w_f.reshape(4, H, K), w_b.reshape(4, H, K)], axis=1)   # (4, 2, H, K)
    return jnp.transpose(w.reshape(8 * H, K))                              # (K, 8H)


def _pack_bias(b_f, b_b):
    """(4H,) combined biases for both directions -> (1, 8H), same column layout."""
    H = b_f.shape[0] // 4
    return jnp.stack([b_f.reshape(4, H), b_b.reshape(4, H)], axis=1).reshape(1, 8 * H)


# ----------------------------- full module forward ---------------------------
def bidirectional_lstm_forward(x, params):
    """x: (T, B, nIn) -> (T, B, nOut), matching the PyTorch module semantics."""
    T, B, nIn = x.shape
    H = params["w_hh_f"].shape[1]
    nOut = params["emb_w"].shape[0]

    Bp = ((B + 7) // 8) * 8            # pad batch to the f32 sublane tile
    Np = ((nOut + 127) // 128) * 128   # pad output lanes to the lane tile

    # --- pack weights once outside the kernel (tiny XLA ops) ---
    zi = jnp.zeros_like(params["w_ih_f"])
    zh = jnp.zeros_like(params["w_hh_f"])
    # Stacked input->gate weights over [x ; reverse_time(x)]:
    #   rows [0:nIn]     -> forward-direction columns only,
    #   rows [nIn:2nIn]  -> backward-direction columns only.
    wx2 = jnp.concatenate(
        [_pack_gate_cols(params["w_ih_f"], zi),
         _pack_gate_cols(zi, params["w_ih_b"])], axis=0)                    # (2*nIn, 8H)
    # Hidden->gate weights, block structured: rows [0:H] = h_fwd inputs, [H:2H] = h_bwd.
    # TODO(synk): at production H (esp. v5e) split into two de-zeroed (B,H)@(H,4H) dots.
    whh = jnp.concatenate(
        [_pack_gate_cols(params["w_hh_f"], zh),
         _pack_gate_cols(zh, params["w_hh_b"])], axis=0)                    # (2H, 8H)
    bias = _pack_bias(params["b_ih_f"] + params["b_hh_f"],
                      params["b_ih_b"] + params["b_hh_b"])                  # (1, 8H)
    ew = jnp.zeros((2 * H, Np), jnp.float32).at[:, :nOut].set(
        jnp.transpose(params["emb_w"]))                                     # (2H, Np)
    eb = jnp.zeros((1, Np), jnp.float32).at[:, :nOut].set(params["emb_b"])  # (1, Np)

    # --- batch padding + fused [x | x_time_reversed] input ---
    xp = jnp.zeros((T, Bp, nIn), jnp.float32).at[:, :B, :].set(x)
    x2 = jnp.concatenate([xp, xp[::-1]], axis=-1).reshape(T * Bp, 2 * nIn)

    vmem = pl.BlockSpec(memory_space=pltpu.MemorySpace.VMEM)
    out2d = pl.pallas_call(
        functools.partial(_bilstm_kernel, Bp=Bp),
        out_shape=jax.ShapeDtypeStruct((T * Bp, Np), jnp.float32),
        in_specs=[vmem] * 6,
        out_specs=vmem,
        scratch_shapes=[
            pltpu.VMEM((T * Bp, 8 * H), jnp.float32),   # pre-blended input-gate precompute
        ],
    )(x2, wx2, whh, bias, ew, eb)
    return out2d.reshape(T, Bp, Np)[:, :B, :nOut]


# ----------------------------- pure-JAX reference ----------------------------
def _lstm_ref_dir(x, w_ih, w_hh, b_ih, b_hh, reverse):
    T, B, _ = x.shape
    H = w_hh.shape[1]
    bias = b_ih + b_hh

    def step(carry, xt):
        h, c = carry
        gates = xt @ w_ih.T + h @ w_hh.T + bias
        i = jax.nn.sigmoid(gates[:, 0 * H:1 * H])
        f = jax.nn.sigmoid(gates[:, 1 * H:2 * H])
        g = jnp.tanh(gates[:, 2 * H:3 * H])
        o = jax.nn.sigmoid(gates[:, 3 * H:4 * H])
        c = f * c + i * g
        h = o * jnp.tanh(c)
        return (h, c), h

    xs = x[::-1] if reverse else x
    init = (jnp.zeros((B, H), jnp.float32), jnp.zeros((B, H), jnp.float32))
    _, hs = jax.lax.scan(step, init, xs)
    return hs[::-1] if reverse else hs


def reference_forward(x, p):
    T, B, _ = x.shape
    hf = _lstm_ref_dir(x, p["w_ih_f"], p["w_hh_f"], p["b_ih_f"], p["b_hh_f"], False)
    hb = _lstm_ref_dir(x, p["w_ih_b"], p["w_hh_b"], p["b_ih_b"], p["b_hh_b"], True)
    rec = jnp.concatenate([hf, hb], axis=-1).reshape(T * B, -1)
    out = rec @ p["emb_w"].T + p["emb_b"]
    return out.reshape(T, B, -1)


# ----------------------------------- main ------------------------------------
if __name__ == "__main__":
    # BidirectionalLSTM(nIn=32, nHidden=32, nOut=16), seq T=8, batch B=2
    T, B, nIn, nHidden, nOut = 8, 2, 32, 32, 16

    key = jax.random.PRNGKey(0)
    ks = jax.random.split(key, 12)
    s = 0.1
    params = {
        "w_ih_f": s * jax.random.normal(ks[0], (4 * nHidden, nIn), jnp.float32),
        "w_hh_f": s * jax.random.normal(ks[1], (4 * nHidden, nHidden), jnp.float32),
        "b_ih_f": s * jax.random.normal(ks[2], (4 * nHidden,), jnp.float32),
        "b_hh_f": s * jax.random.normal(ks[3], (4 * nHidden,), jnp.float32),
        "w_ih_b": s * jax.random.normal(ks[4], (4 * nHidden, nIn), jnp.float32),
        "w_hh_b": s * jax.random.normal(ks[5], (4 * nHidden, nHidden), jnp.float32),
        "b_ih_b": s * jax.random.normal(ks[6], (4 * nHidden,), jnp.float32),
        "b_hh_b": s * jax.random.normal(ks[7], (4 * nHidden,), jnp.float32),
        "emb_w": s * jax.random.normal(ks[8], (nOut, 2 * nHidden), jnp.float32),
        "emb_b": s * jax.random.normal(ks[9], (nOut,), jnp.float32),
    }
    x = jax.random.normal(ks[10], (T, B, nIn), jnp.float32)

    out = bidirectional_lstm_forward(x, params)
    out = jax.block_until_ready(out)

    ref = reference_forward(x, params)
    assert out.shape == (T, B, nOut), out.shape
    assert jnp.allclose(out, ref, atol=1e-4, rtol=1e-4), float(jnp.max(jnp.abs(out - ref)))

    print("KERNEL_OK")
</pallas_src>

<mosaic_0001>
module attributes {stable_mosaic.version = 11 : i64} {
  func.func @_bilstm_kernel(%arg0: memref<64x64xf32, #tpu.memory_space<vmem>>, %arg1: memref<64x256xf32, #tpu.memory_space<vmem>>, %arg2: memref<64x256xf32, #tpu.memory_space<vmem>>, %arg3: memref<1x256xf32, #tpu.memory_space<vmem>>, %arg4: memref<64x128xf32, #tpu.memory_space<vmem>>, %arg5: memref<1x128xf32, #tpu.memory_space<vmem>>, %arg6: memref<64x128xf32, #tpu.memory_space<vmem>>, %arg7: memref<64x256xf32, #tpu.memory_space<vmem>>) attributes {dimension_semantics = [], scalar_prefetch = 0 : i64, scratch_operands = 1 : i64, tpu.core_type = #tpu.core_type<tc>} {
    %c0 = arith.constant 0 : index
    %c0_0 = arith.constant 0 : index
    %0 = vector.load %arg0[%c0, %c0_0] : memref<64x64xf32, #tpu.memory_space<vmem>>, vector<64x64xf32>
    %c0_1 = arith.constant 0 : index
    %c0_2 = arith.constant 0 : index
    %1 = vector.load %arg1[%c0_1, %c0_2] : memref<64x256xf32, #tpu.memory_space<vmem>>, vector<64x256xf32>
    %cst = arith.constant dense<0.000000e+00> : vector<64x256xf32>
    %2 = tpu.matmul %0, %1, %cst {dimension_numbers = #tpu.dot_dimension_numbers<[1], [0], [0], [1], [0, 0, 1, 1], [], []>} : vector<64x64xf32>, vector<64x256xf32>, vector<64x256xf32> -> vector<64x256xf32>
    %c0_3 = arith.constant 0 : index
    %c0_4 = arith.constant 0 : index
    %3 = vector.load %arg3[%c0_3, %c0_4] : memref<1x256xf32, #tpu.memory_space<vmem>>, vector<1x256xf32>
    %4 = vector.broadcast %3 : vector<1x256xf32> to vector<64x256xf32>
    %5 = arith.addf %2, %4 : vector<64x256xf32>
    %c0_5 = arith.constant 0 : index
    %c0_6 = arith.constant 0 : index
    %6 = vector.load %arg7[%c0_5, %c0_6] : memref<64x256xf32, #tpu.memory_space<vmem>>, vector<64x256xf32>
    tpu.vector_store %arg7[%c0_5, %c0_6], %5 {strides = array<i32>} : memref<64x256xf32, #tpu.memory_space<vmem>>, vector<64x256xf32>,
    %c0_7 = arith.constant 0 : index
    %c0_8 = arith.constant 0 : index
    %7 = vector.load %arg2[%c0_7, %c0_8] : memref<64x256xf32, #tpu.memory_space<vmem>>, vector<64x256xf32>
    %8 = tpu.iota {dimensions = array<i32: 1>} : vector<8x128xi32>
    %c64_i32 = arith.constant 64 : i32
    %9 = vector.broadcast %c64_i32 : i32 to vector<8x128xi32>
    %10 = arith.cmpi slt, %8, %9 : vector<8x128xi32>
    %11 = tpu.iota {dimensions = array<i32: 1>} : vector<8x64xi32>
    %c32_i32 = arith.constant 32 : i32
    %12 = vector.broadcast %c32_i32 : i32 to vector<8x64xi32>
    %13 = arith.cmpi slt, %11, %12 : vector<8x64xi32>
    %cst_9 = arith.constant 0.000000e+00 : f32
    %14 = vector.broadcast %cst_9 : f32 to vector<8x64xf32>
    %cst_10 = arith.constant 0.000000e+00 : f32
    %15 = vector.broadcast %cst_10 : f32 to vector<8x64xf32>
    %c0_11 = arith.constant 0 : index
    %c0_12 = arith.constant 0 : index
    %16 = vector.load %arg7[%c0_11, %c0_12] : memref<64x256xf32, #tpu.memory_space<vmem>>, vector<8x256xf32>
    %cst_13 = arith.constant dense<0.000000e+00> : vector<8x256xf32>
    %17 = tpu.matmul %14, %7, %cst_13 {dimension_numbers = #tpu.dot_dimension_numbers<[1], [0], [0], [1], [0, 0, 1, 1], [], []>} : vector<8x64xf32>, vector<64x256xf32>, vector<8x256xf32> -> vector<8x256xf32>
    %18 = arith.addf %16, %17 : vector<8x256xf32>
    %19 = vector.extract_strided_slice %18 {offsets = [0, 0], sizes = [8, 128], strides = [1, 1]} : vector<8x256xf32> to vector<8x128xf32>
    %20 = arith.negf %19 : vector<8x128xf32>
    %21 = math.exp %20 : vector<8x128xf32>
    %cst_14 = arith.constant 1.000000e+00 : f32
    %22 = vector.broadcast %cst_14 : f32 to vector<8x128xf32>
    %23 = arith.addf %22, %21 : vector<8x128xf32>
    %24 = arith.divf %22, %23 : vector<8x128xf32>
    %25 = vector.extract_strided_slice %18 {offsets = [0, 128], sizes = [8, 128], strides = [1, 1]} : vector<8x256xf32> to vector<8x128xf32>
    %26 = math.tanh %25 : vector<8x128xf32>
    %27 = arith.negf %25 : vector<8x128xf32>
    %28 = math.exp %27 : vector<8x128xf32>
    %cst_15 = arith.constant 1.000000e+00 : f32
    %29 = vector.broadcast %cst_15 : f32 to vector<8x128xf32>
    %30 = arith.addf %29, %28 : vector<8x128xf32>
    %31 = arith.divf %29, %30 : vector<8x128xf32>
    %32 = arith.select %10, %26, %31 : vector<8x128xi1>, vector<8x128xf32>
    %33 = vector.extract_strided_slice %24 {offsets = [0, 0], sizes = [8, 64], strides = [1, 1]} : vector<8x128xf32> to vector<8x64xf32>
    %34 = vector.extract_strided_slice %24 {offsets = [0, 64], sizes = [8, 64], strides = [1, 1]} : vector<8x128xf32> to vector<8x64xf32>
    %35 = vector.extract_strided_slice %32 {offsets = [0, 0], sizes = [8, 64], strides = [1, 1]} : vector<8x128xf32> to vector<8x64xf32>
    %36 = vector.extract_strided_slice %32 {offsets = [0, 64], sizes = [8, 64], strides = [1, 1]} : vector<8x128xf32> to vector<8x64xf32>
    %37 = arith.mulf %34, %15 : vector<8x64xf32>
    %38 = arith.mulf %33, %35 : vector<8x64xf32>
    %39 = arith.addf %37, %38 : vector<8x64xf32>
    %40 = math.tanh %39 : vector<8x64xf32>
    %41 = arith.mulf %36, %40 : vector<8x64xf32>
    %c8 = arith.constant 8 : index
    %c0_16 = arith.constant 0 : index
    %42 = vector.load %arg7[%c8, %c0_16] : memref<64x256xf32, #tpu.memory_space<vmem>>, vector<8x256xf32>
    %cst_17 = arith.constant dense<0.000000e+00> : vector<8x256xf32>
    %43 = tpu.matmul %41, %7, %cst_17 {dimension_numbers = #tpu.dot_dimension_numbers<[1], [0], [0], [1], [0, 0, 1, 1], [], []>} : vector<8x64xf32>, vector<64x256xf32>, vector<8x256xf32> -> vector<8x256xf32>
    %44 = arith.addf %42, %43 : vector<8x256xf32>
    %45 = vector.extract_strided_slice %44 {offsets = [0, 0], sizes = [8, 128], strides = [1, 1]} : vector<8x256xf32> to vector<8x128xf32>
    %46 = arith.negf %45 : vector<8x128xf32>
    %47 = math.exp %46 : vector<8x128xf32>
    %cst_18 = arith.constant 1.000000e+00 : f32
    %48 = vector.broadcast %cst_18 : f32 to vector<8x128xf32>
    %49 = arith.addf %48, %47 : vector<8x128xf32>
    %50 = arith.divf %48, %49 : vector<8x128xf32>
    %51 = vector.extract_strided_slice %44 {offsets = [0, 128], sizes = [8, 128], strides = [1, 1]} : vector<8x256xf32> to vector<8x128xf32>
    %52 = math.tanh %51 : vector<8x128xf32>
    %53 = arith.negf %51 : vector<8x128xf32>
    %54 = math.exp %53 : vector<8x128xf32>
    %cst_19 = arith.constant 1.000000e+00 : f32
    %55 = vector.broadcast %cst_19 : f32 to vector<8x128xf32>
    %56 = arith.addf %55, %54 : vector<8x128xf32>
    %57 = arith.divf %55, %56 : vector<8x128xf32>
    %58 = arith.select %10, %52, %57 : vector<8x128xi1>, vector<8x128xf32>
    %59 = vector.extract_strided_slice %50 {offsets = [0, 0], sizes = [8, 64], strides = [1, 1]} : vector<8x128xf32> to vector<8x64xf32>
    %60 = vector.extract_strided_slice %50 {offsets = [0, 64], sizes = [8, 64], strides = [1, 1]} : vector<8x128xf32> to vector<8x64xf32>
    %61 = vector.extract_strided_slice %58 {offsets = [0, 0], sizes = [8, 64], strides = [1, 1]} : vector<8x128xf32> to vector<8x64xf32>
    %62 = vector.extract_strided_slice %58 {offsets = [0, 64], sizes = [8, 64], strides = [1, 1]} : vector<8x128xf32> to vector<8x64xf32>
    %63 = arith.mulf %60, %39 : vector<8x64xf32>
    %64 = arith.mulf %59, %61 : vector<8x64xf32>
    %65 = arith.addf %63, %64 : vector<8x64xf32>
    %66 = math.tanh %65 : vector<8x64xf32>
    %67 = arith.mulf %62, %66 : vector<8x64xf32>
    %c16 = arith.constant 16 : index
    %c0_20 = arith.constant 0 : index
    %68 = vector.load %arg7[%c16, %c0_20] : memref<64x256xf32, #tpu.memory_space<vmem>>, vector<8x256xf32>
    %cst_21 = arith.constant dense<0.000000e+00> : vector<8x256xf32>
    %69 = tpu.matmul %67, %7, %cst_21 {dimension_numbers = #tpu.dot_dimension_numbers<[1], [0], [0], [1], [0, 0, 1, 1], [], []>} : vector<8x64xf32>, vector<64x256xf32>, vector<8x256xf32> -> vector<8x256xf32>
    %70 = arith.addf %68, %69 : vector<8x256xf32>
    %71 = vector.extract_strided_slice %70 {offsets = [0, 0], sizes = [8, 128], strides = [1, 1]} : vector<8x256xf32> to vector<8x128xf32>
    %72 = arith.negf %71 : vector<8x128xf32>
    %73 = math.exp %72 : vector<8x128xf32>
    %cst_22 = arith.constant 1.000000e+00 : f32
    %74 = vector.broadcast %cst_22 : f32 to vector<8x128xf32>
    %75 = arith.addf %74, %73 : vector<8x128xf32>
    %76 = arith.divf %74, %75 : vector<8x128xf32>
    %77 = vector.extract_strided_slice %70 {offsets = [0, 128], sizes = [8, 128], strides = [1, 1]} : vector<8x256xf32> to vector<8x128xf32>
    %78 = math.tanh %77 : vector<8x128xf32>
    %79 = arith.negf %77 : vector<8x128xf32>
    %80 = math.exp %79 : vector<8x128xf32>
    %cst_23 = arith.constant 1.000000e+00 : f32
    %81 = vector.broadcast %cst_23 : f32 to vector<8x128xf32>
    %82 = arith.addf %81, %80 : vector<8x128xf32>
    %83 = arith.divf %81, %82 : vector<8x128xf32>
    %84 = arith.select %10, %78, %83 : vector<8x128xi1>, vector<8x128xf32>
    %85 = vector.extract_strided_slice %76 {offsets = [0, 0], sizes = [8, 64], strides = [1, 1]} : vector<8x128xf32> to vector<8x64xf32>
    %86 = vector.extract_strided_slice %76 {offsets = [0, 64], sizes = [8, 64], strides = [1, 1]} : vector<8x128xf32> to vector<8x64xf32>
    %87 = vector.extract_strided_slice %84 {offsets = [0, 0], sizes = [8, 64], strides = [1, 1]} : vector<8x128xf32> to vector<8x64xf32>
    %88 = vector.extract_strided_slice %84 {offsets = [0, 64], sizes = [8, 64], strides = [1, 1]} : vector<8x128xf32> to vector<8x64xf32>
    %89 = arith.mulf %86, %65 : vector<8x64xf32>
    %90 = arith.mulf %85, %87 : vector<8x64xf32>
    %91 = arith.addf %89, %90 : vector<8x64xf32>
    %92 = math.tanh %91 : vector<8x64xf32>
    %93 = arith.mulf %88, %92 : vector<8x64xf32>
    %c24 = arith.constant 24 : index
    %c0_24 = arith.constant 0 : index
    %94 = vector.load %arg7[%c24, %c0_24] : memref<64x256xf32, #tpu.memory_space<vmem>>, vector<8x256xf32>
    %cst_25 = arith.constant dense<0.000000e+00> : vector<8x256xf32>
    %95 = tpu.matmul %93, %7, %cst_25 {dimension_numbers = #tpu.dot_dimension_numbers<[1], [0], [0], [1], [0, 0, 1, 1], [], []>} : vector<8x64xf32>, vector<64x256xf32>, vector<8x256xf32> -> vector<8x256xf32>
    %96 = arith.addf %94, %95 : vector<8x256xf32>
    %97 = vector.extract_strided_slice %96 {offsets = [0, 0], sizes = [8, 128], strides = [1, 1]} : vector<8x256xf32> to vector<8x128xf32>
    %98 = arith.negf %97 : vector<8x128xf32>
    %99 = math.exp %98 : vector<8x128xf32>
    %cst_26 = arith.constant 1.000000e+00 : f32
    %100 = vector.broadcast %cst_26 : f32 to vector<8x128xf32>
    %101 = arith.addf %100, %99 : vector<8x128xf32>
    %102 = arith.divf %100, %101 : vector<8x128xf32>
    %103 = vector.extract_strided_slice %96 {offsets = [0, 128], sizes = [8, 128], strides = [1, 1]} : vector<8x256xf32> to vector<8x128xf32>
    %104 = math.tanh %103 : vector<8x128xf32>
    %105 = arith.negf %103 : vector<8x128xf32>
    %106 = math.exp %105 : vector<8x128xf32>
    %cst_27 = arith.constant 1.000000e+00 : f32
    %107 = vector.broadcast %cst_27 : f32 to vector<8x128xf32>
    %108 = arith.addf %107, %106 : vector<8x128xf32>
    %109 = arith.divf %107, %108 : vector<8x128xf32>
    %110 = arith.select %10, %104, %109 : vector<8x128xi1>, vector<8x128xf32>
    %111 = vector.extract_strided_slice %102 {offsets = [0, 0], sizes = [8, 64], strides = [1, 1]} : vector<8x128xf32> to vector<8x64xf32>
    %112 = vector.extract_strided_slice %102 {offsets = [0, 64], sizes = [8, 64], strides = [1, 1]} : vector<8x128xf32> to vector<8x64xf32>
    %113 = vector.extract_strided_slice %110 {offsets = [0, 0], sizes = [8, 64], strides = [1, 1]} : vector<8x128xf32> to vector<8x64xf32>
    %114 = vector.extract_strided_slice %110 {offsets = [0, 64], sizes = [8, 64], strides = [1, 1]} : vector<8x128xf32> to vector<8x64xf32>
    %115 = arith.mulf %112, %91 : vector<8x64xf32>
    %116 = arith.mulf %111, %113 : vector<8x64xf32>
    %117 = arith.addf %115, %116 : vector<8x64xf32>
    %118 = math.tanh %117 : vector<8x64xf32>
    %119 = arith.mulf %114, %118 : vector<8x64xf32>
    %c32 = arith.constant 32 : index
    %c0_28 = arith.constant 0 : index
    %120 = vector.load %arg7[%c32, %c0_28] : memref<64x256xf32, #tpu.memory_space<vmem>>, vector<8x256xf32>
    %cst_29 = arith.constant dense<0.000000e+00> : vector<8x256xf32>
    %121 = tpu.matmul %119, %7, %cst_29 {dimension_numbers = #tpu.dot_dimension_numbers<[1], [0], [0], [1], [0, 0, 1, 1], [], []>} : vector<8x64xf32>, vector<64x256xf32>, vector<8x256xf32> -> vector<8x256xf32>
    %122 = arith.addf %120, %121 : vector<8x256xf32>
    %123 = vector.extract_strided_slice %122 {offsets = [0, 0], sizes = [8, 128], strides = [1, 1]} : vector<8x256xf32> to vector<8x128xf32>
    %124 = arith.negf %123 : vector<8x128xf32>
    %125 = math.exp %124 : vector<8x128xf32>
    %cst_30 = arith.constant 1.000000e+00 : f32
    %126 = vector.broadcast %cst_30 : f32 to vector<8x128xf32>
    %127 = arith.addf %126, %125 : vector<8x128xf32>
    %128 = arith.divf %126, %127 : vector<8x128xf32>
    %129 = vector.extract_strided_slice %122 {offsets = [0, 128], sizes = [8, 128], strides = [1, 1]} : vector<8x256xf32> to vector<8x128xf32>
    %130 = math.tanh %129 : vector<8x128xf32>
    %131 = arith.negf %129 : vector<8x128xf32>
    %132 = math.exp %131 : vector<8x128xf32>
    %cst_31 = arith.constant 1.000000e+00 : f32
    %133 = vector.broadcast %cst_31 : f32 to vector<8x128xf32>
    %134 = arith.addf %133, %132 : vector<8x128xf32>
    %135 = arith.divf %133, %134 : vector<8x128xf32>
    %136 = arith.select %10, %130, %135 : vector<8x128xi1>, vector<8x128xf32>
    %137 = vector.extract_strided_slice %128 {offsets = [0, 0], sizes = [8, 64], strides = [1, 1]} : vector<8x128xf32> to vector<8x64xf32>
    %138 = vector.extract_strided_slice %128 {offsets = [0, 64], sizes = [8, 64], strides = [1, 1]} : vector<8x128xf32> to vector<8x64xf32>
    %139 = vector.extract_strided_slice %136 {offsets = [0, 0], sizes = [8, 64], strides = [1, 1]} : vector<8x128xf32> to vector<8x64xf32>
    %140 = vector.extract_strided_slice %136 {offsets = [0, 64], sizes = [8, 64], strides = [1, 1]} : vector<8x128xf32> to vector<8x64xf32>
    %141 = arith.mulf %138, %117 : vector<8x64xf32>
    %142 = arith.mulf %137, %139 : vector<8x64xf32>
    %143 = arith.addf %141, %142 : vector<8x64xf32>
    %144 = math.tanh %143 : vector<8x64xf32>
    %145 = arith.mulf %140, %144 : vector<8x64xf32>
    %c40 = arith.constant 40 : index
    %c0_32 = arith.constant 0 : index
    %146 = vector.load %arg7[%c40, %c0_32] : memref<64x256xf32, #tpu.memory_space<vmem>>, vector<8x256xf32>
    %cst_33 = arith.constant dense<0.000000e+00> : vector<8x256xf32>
    %147 = tpu.matmul %145, %7, %cst_33 {dimension_numbers = #tpu.dot_dimension_numbers<[1], [0], [0], [1], [0, 0, 1, 1], [], []>} : vector<8x64xf32>, vector<64x256xf32>, vector<8x256xf32> -> vector<8x256xf32>
    %148 = arith.addf %146, %147 : vector<8x256xf32>
    %149 = vector.extract_strided_slice %148 {offsets = [0, 0], sizes = [8, 128], strides = [1, 1]} : vector<8x256xf32> to vector<8x128xf32>
    %150 = arith.negf %149 : vector<8x128xf32>
    %151 = math.exp %150 : vector<8x128xf32>
    %cst_34 = arith.constant 1.000000e+00 : f32
    %152 = vector.broadcast %cst_34 : f32 to vector<8x128xf32>
    %153 = arith.addf %152, %151 : vector<8x128xf32>
    %154 = arith.divf %152, %153 : vector<8x128xf32>
    %155 = vector.extract_strided_slice %148 {offsets = [0, 128], sizes = [8, 128], strides = [1, 1]} : vector<8x256xf32> to vector<8x128xf32>
    %156 = math.tanh %155 : vector<8x128xf32>
    %157 = arith.negf %155 : vector<8x128xf32>
    %158 = math.exp %157 : vector<8x128xf32>
    %cst_35 = arith.constant 1.000000e+00 : f32
    %159 = vector.broadcast %cst_35 : f32 to vector<8x128xf32>
    %160 = arith.addf %159, %158 : vector<8x128xf32>
    %161 = arith.divf %159, %160 : vector<8x128xf32>
    %162 = arith.select %10, %156, %161 : vector<8x128xi1>, vector<8x128xf32>
    %163 = vector.extract_strided_slice %154 {offsets = [0, 0], sizes = [8, 64], strides = [1, 1]} : vector<8x128xf32> to vector<8x64xf32>
    %164 = vector.extract_strided_slice %154 {offsets = [0, 64], sizes = [8, 64], strides = [1, 1]} : vector<8x128xf32> to vector<8x64xf32>
    %165 = vector.extract_strided_slice %162 {offsets = [0, 0], sizes = [8, 64], strides = [1, 1]} : vector<8x128xf32> to vector<8x64xf32>
    %166 = vector.extract_strided_slice %162 {offsets = [0, 64], sizes = [8, 64], strides = [1, 1]} : vector<8x128xf32> to vector<8x64xf32>
    %167 = arith.mulf %164, %143 : vector<8x64xf32>
    %168 = arith.mulf %163, %165 : vector<8x64xf32>
    %169 = arith.addf %167, %168 : vector<8x64xf32>
    %170 = math.tanh %169 : vector<8x64xf32>
    %171 = arith.mulf %166, %170 : vector<8x64xf32>
    %c48 = arith.constant 48 : index
    %c0_36 = arith.constant 0 : index
    %172 = vector.load %arg7[%c48, %c0_36] : memref<64x256xf32, #tpu.memory_space<vmem>>, vector<8x256xf32>
    %cst_37 = arith.constant dense<0.000000e+00> : vector<8x256xf32>
    %173 = tpu.matmul %171, %7, %cst_37 {dimension_numbers = #tpu.dot_dimension_numbers<[1], [0], [0], [1], [0, 0, 1, 1], [], []>} : vector<8x64xf32>, vector<64x256xf32>, vector<8x256xf32> -> vector<8x256xf32>
    %174 = arith.addf %172, %173 : vector<8x256xf32>
    %175 = vector.extract_strided_slice %174 {offsets = [0, 0], sizes = [8, 128], strides = [1, 1]} : vector<8x256xf32> to vector<8x128xf32>
    %176 = arith.negf %175 : vector<8x128xf32>
    %177 = math.exp %176 : vector<8x128xf32>
    %cst_38 = arith.constant 1.000000e+00 : f32
    %178 = vector.broadcast %cst_38 : f32 to vector<8x128xf32>
    %179 = arith.addf %178, %177 : vector<8x128xf32>
    %180 = arith.divf %178, %179 : vector<8x128xf32>
    %181 = vector.extract_strided_slice %174 {offsets = [0, 128], sizes = [8, 128], strides = [1, 1]} : vector<8x256xf32> to vector<8x128xf32>
    %182 = math.tanh %181 : vector<8x128xf32>
    %183 = arith.negf %181 : vector<8x128xf32>
    %184 = math.exp %183 : vector<8x128xf32>
    %cst_39 = arith.constant 1.000000e+00 : f32
    %185 = vector.broadcast %cst_39 : f32 to vector<8x128xf32>
    %186 = arith.addf %185, %184 : vector<8x128xf32>
    %187 = arith.divf %185, %186 : vector<8x128xf32>
    %188 = arith.select %10, %182, %187 : vector<8x128xi1>, vector<8x128xf32>
    %189 = vector.extract_strided_slice %180 {offsets = [0, 0], sizes = [8, 64], strides = [1, 1]} : vector<8x128xf32> to vector<8x64xf32>
    %190 = vector.extract_strided_slice %180 {offsets = [0, 64], sizes = [8, 64], strides = [1, 1]} : vector<8x128xf32> to vector<8x64xf32>
    %191 = vector.extract_strided_slice %188 {offsets = [0, 0], sizes = [8, 64], strides = [1, 1]} : vector<8x128xf32> to vector<8x64xf32>
    %192 = vector.extract_strided_slice %188 {offsets = [0, 64], sizes = [8, 64], strides = [1, 1]} : vector<8x128xf32> to vector<8x64xf32>
    %193 = arith.mulf %190, %169 : vector<8x64xf32>
    %194 = arith.mulf %189, %191 : vector<8x64xf32>
    %195 = arith.addf %193, %194 : vector<8x64xf32>
    %196 = math.tanh %195 : vector<8x64xf32>
    %197 = arith.mulf %192, %196 : vector<8x64xf32>
    %c56 = arith.constant 56 : index
    %c0_40 = arith.constant 0 : index
    %198 = vector.load %arg7[%c56, %c0_40] : memref<64x256xf32, #tpu.memory_space<vmem>>, vector<8x256xf32>
    %cst_41 = arith.constant dense<0.000000e+00> : vector<8x256xf32>
    %199 = tpu.matmul %197, %7, %cst_41 {dimension_numbers = #tpu.dot_dimension_numbers<[1], [0], [0], [1], [0, 0, 1, 1], [], []>} : vector<8x64xf32>, vector<64x256xf32>, vector<8x256xf32> -> vector<8x256xf32>
    %200 = arith.addf %198, %199 : vector<8x256xf32>
    %201 = vector.extract_strided_slice %200 {offsets = [0, 0], sizes = [8, 128], strides = [1, 1]} : vector<8x256xf32> to vector<8x128xf32>
    %202 = arith.negf %201 : vector<8x128xf32>
    %203 = math.exp %202 : vector<8x128xf32>
    %cst_42 = arith.constant 1.000000e+00 : f32
    %204 = vector.broadcast %cst_42 : f32 to vector<8x128xf32>
    %205 = arith.addf %204, %203 : vector<8x128xf32>
    %206 = arith.divf %204, %205 : vector<8x128xf32>
    %207 = vector.extract_strided_slice %200 {offsets = [0, 128], sizes = [8, 128], strides = [1, 1]} : vector<8x256xf32> to vector<8x128xf32>
    %208 = math.tanh %207 : vector<8x128xf32>
    %209 = arith.negf %207 : vector<8x128xf32>
    %210 = math.exp %209 : vector<8x128xf32>
    %cst_43 = arith.constant 1.000000e+00 : f32
    %211 = vector.broadcast %cst_43 : f32 to vector<8x128xf32>
    %212 = arith.addf %211, %210 : vector<8x128xf32>
    %213 = arith.divf %211, %212 : vector<8x128xf32>
    %214 = arith.select %10, %208, %213 : vector<8x128xi1>, vector<8x128xf32>
    %215 = vector.extract_strided_slice %206 {offsets = [0, 0], sizes = [8, 64], strides = [1, 1]} : vector<8x128xf32> to vector<8x64xf32>
    %216 = vector.extract_strided_slice %206 {offsets = [0, 64], sizes = [8, 64], strides = [1, 1]} : vector<8x128xf32> to vector<8x64xf32>
    %217 = vector.extract_strided_slice %214 {offsets = [0, 0], sizes = [8, 64], strides = [1, 1]} : vector<8x128xf32> to vector<8x64xf32>
    %218 = vector.extract_strided_slice %214 {offsets = [0, 64], sizes = [8, 64], strides = [1, 1]} : vector<8x128xf32> to vector<8x64xf32>
    %219 = arith.mulf %216, %195 : vector<8x64xf32>
    %220 = arith.mulf %215, %217 : vector<8x64xf32>
    %221 = arith.addf %219, %220 : vector<8x64xf32>
    %222 = math.tanh %221 : vector<8x64xf32>
    %223 = arith.mulf %218, %222 : vector<8x64xf32>
    %224 = arith.select %13, %41, %223 : vector<8x64xi1>, vector<8x64xf32>
    %225 = arith.select %13, %67, %197 : vector<8x64xi1>, vector<8x64xf32>
    %226 = arith.select %13, %93, %171 : vector<8x64xi1>, vector<8x64xf32>
    %227 = arith.select %13, %119, %145 : vector<8x64xi1>, vector<8x64xf32>
    %228 = arith.select %13, %145, %119 : vector<8x64xi1>, vector<8x64xf32>
    %229 = arith.select %13, %171, %93 : vector<8x64xi1>, vector<8x64xf32>
    %230 = arith.select %13, %197, %67 : vector<8x64xi1>, vector<8x64xf32>
    %231 = arith.select %13, %223, %41 : vector<8x64xi1>, vector<8x64xf32>
    %232 = tpu.concatenate %224, %225, %226, %227, %228, %229, %230, %231 in 0 : vector<8x64xf32>, vector<8x64xf32>, vector<8x64xf32>, vector<8x64xf32>, vector<8x64xf32>, vector<8x64xf32>, vector<8x64xf32>, vector<8x64xf32> -> vector<64x64xf32>
    %c0_44 = arith.constant 0 : index
    %c0_45 = arith.constant 0 : index
    %233 = vector.load %arg4[%c0_44, %c0_45] : memref<64x128xf32, #tpu.memory_space<vmem>>, vector<64x128xf32>
    %cst_46 = arith.constant dense<0.000000e+00> : vector<64x128xf32>
    %234 = tpu.matmul %232, %233, %cst_46 {dimension_numbers = #tpu.dot_dimension_numbers<[1], [0], [0], [1], [0, 0, 1, 1], [], []>} : vector<64x64xf32>, vector<64x128xf32>, vector<64x128xf32> -> vector<64x128xf32>
    %c0_47 = arith.constant 0 : index
    %c0_48 = arith.constant 0 : index
    %235 = vector.load %arg5[%c0_47, %c0_48] : memref<1x128xf32, #tpu.memory_space<vmem>>, vector<1x128xf32>
    %236 = vector.broadcast %235 : vector<1x128xf32> to vector<64x128xf32>
    %237 = arith.addf %234, %236 : vector<64x128xf32>
    %c0_49 = arith.constant 0 : index
    %c0_50 = arith.constant 0 : index
    %238 = vector.load %arg6[%c0_49, %c0_50] : memref<64x128xf32, #tpu.memory_space<vmem>>, vector<64x128xf32>
    tpu.vector_store %arg6[%c0_49, %c0_50], %237 {strides = array<i32>} : memref<64x128xf32, #tpu.memory_space<vmem>>, vector<64x128xf32>,
    return
  }
}

</mosaic_0001>

<bundles_post_ra>
// kernel: tpu_custom_call.1
= control target key start
LH: loop header
LB: loop body
LE: loop exit
PB: predicated region body
PF: predicated region fallthrough
CT: control target
= control target key end

     0   :  { %11 = vsyncpa [#allocation4], 0  ;;  %s2199_s0 = inlined_call_operand.hbm [shape: f32[64,64], index: 0, kind: input, shape index: {}]   ;;  %s2200_s1 = inlined_call_operand.hbm [shape: f32[64,256], index: 1, kind: input, shape index: {}]   ;;  %s2201_s2 = inlined_call_operand.hbm [shape: f32[64,256], index: 2, kind: input, shape index: {}]   ;;  %s2202_s3 = inlined_call_operand.vmem [shape: f32[1,256], index: 3, kind: input, shape index: {}]   ;;  %s2203_s4 = inlined_call_operand.hbm [shape: f32[64,128], index: 4, kind: input, shape index: {}]   ;;  %s2204_s5 = inlined_call_operand.vmem [shape: f32[1,128], index: 5, kind: input, shape index: {}]   ;;  %s2205_s6 = inlined_call_operand.hbm [shape: f32[64,128], index: 6, kind: output, shape index: {}]  }
   0x1   :  { %12 = vsyncpa [#allocation7], 0 }
   0x2   :  { %13 = vsyncpa [#allocation10], 0 }
   0x3   :  { %14 = vsyncpa [#allocation5], 0  ;;  %s1802_s21 = smov [#allocation6]   ;;  %s1684_s25 = scalar_lea.hbm %s2200_s1, 2048 }
   0x4   :  { %s32_s22 = sshll.u32 %s1802_s21, 4  ;;  %p1685_p0 = scmp.ne.s32.totalorder %s2200_s1, %s1684_s25  ;;  %s33_s22 = int_to_ptr.vmem [resolvable:$true] %s32_s22 }
   0x5   :  { %p1688_p1 = scmp.lt.u32.totalorder %s1684_s25, %s2200_s1 }
   0x7   :  { %p1690_p2 = pnand %p1688_p1, %p1685_p0 }
   0x9   :  { %1693 = shalt.err (!%p1690_p2)
}
   0xa   :  { %s1694_s30 = scalar_lea.vmem %s33_s22, 2048  ;;  %p1699_p4 = scmp.lt.s32.totalorder %s33_s22, %s33_s22 }
   0xb   :  { %p1695_p3 = scmp.ne.s32.totalorder %s33_s22, %s1694_s30  ;;  %p1700_p5 = scmp.lt.s32.totalorder %s1694_s30, %s1694_s30 }
   0xd   :  { %p1701_p6 = por %p1700_p5, %p1699_p4 }
   0xf   :  { %p1702_p7 = pnand %p1701_p6, %p1695_p3 }
  0x11   :  { %1705 = shalt.err (!%p1702_p7)
}
  0x12   :  { %s1803_s7 = smov 256   ;;  %s1804_s8 = smov 16  }
  0x13   :  { %38 = dma.hbm_to_vmem [thread:$0]  %s2200_s1, 2048, %s33_s22, [#allocation7], %s1803_s7, %s1803_s7, %s1804_s8  }
  0x14   :  { %s1805_s11 = smov [#allocation3]   ;;  %s1706_s15 = scalar_lea.hbm %s2199_s0, 1024 }
  0x15   :  { %s20_s12 = sshll.u32 %s1805_s11, 4  ;;  %p1707_p8 = scmp.ne.s32.totalorder %s2199_s0, %s1706_s15  ;;  %s21_s12 = int_to_ptr.vmem [resolvable:$true] %s20_s12 }
  0x16   :  { %p1710_p9 = scmp.lt.u32.totalorder %s1706_s15, %s2199_s0 }
  0x18   :  { %p1712_p10 = pnand %p1710_p9, %p1707_p8 }
  0x1a   :  { %1715 = shalt.err (!%p1712_p10)
}
  0x1b   :  { %s1716_s20 = scalar_lea.vmem %s21_s12, 1024  ;;  %p1721_p12 = scmp.lt.s32.totalorder %s21_s12, %s21_s12 }
  0x1c   :  { %p1717_p11 = scmp.ne.s32.totalorder %s21_s12, %s1716_s20  ;;  %p1722_p13 = scmp.lt.s32.totalorder %s1716_s20, %s1716_s20 }
  0x1e   :  { %p1723_p0 = por %p1722_p13, %p1721_p12 }
  0x20   :  { %p1724_p1 = pnand %p1723_p0, %p1717_p11 }
  0x22   :  { %1727 = shalt.err (!%p1724_p1)
}
  0x23   :  { %s1806_s1 = smov 128   ;;  %s1807_s21 = smov 8  }
  0x24   :  { %26 = dma.hbm_to_vmem [thread:$0]  %s2199_s0, 1024, %s21_s12, [#allocation4], %s1806_s1, %s1806_s1, %s1807_s21  }
  0x25   :  { %s1808_s24 = smov [#allocation8]   ;;  %s1809_s26 = smov [#allocation9]  }
  0x26   :  { %s44_s25 = sshll.u32 %s1808_s24, 4  ;;  %s58_s27 = sshll.u32 %s1809_s26, 4  ;;  %s45_s25 = int_to_ptr.vmem [resolvable:$true] %s44_s25  ;;  %s1878_s27 = int_to_ptr.vmem [resolvable:$true] %s58_s27 }
  0x27   :  { %s1728_s30 = scalar_lea.hbm %s2201_s2, 2048 }
  0x28   :  { %p1729_p2 = scmp.ne.s32.totalorder %s2201_s2, %s1728_s30  ;;  %p1732_p3 = scmp.lt.u32.totalorder %s1728_s30, %s2201_s2 }
  0x2a   :  { %p1734_p4 = pnand %p1732_p3, %p1729_p2 }
  0x2c   :  { %1737 = shalt.err (!%p1734_p4)
}
  0x2d   :  { %s1738_s0 = scalar_lea.vmem %s45_s25, 2048  ;;  %p1743_p6 = scmp.lt.s32.totalorder %s45_s25, %s45_s25 }
  0x2e   :  { %p1739_p5 = scmp.ne.s32.totalorder %s45_s25, %s1738_s0  ;;  %p1744_p7 = scmp.lt.s32.totalorder %s1738_s0, %s1738_s0 }
  0x30   :  { %p1745_p8 = por %p1744_p7, %p1743_p6 }
  0x32   :  { %p1746_p9 = pnand %p1745_p8, %p1739_p5 }
  0x34   :  { %1749 = shalt.err (!%p1746_p9)
}
  0x35   :  { %50 = dma.hbm_to_vmem [thread:$0]  %s2201_s2, 2048, %s45_s25, [#allocation7], %s1803_s7, %s1803_s7, %s1804_s8  }
  0x36   :  { %s1750_s17 = scalar_lea.hbm %s2203_s4, 1024 }
  0x37   :  { %p1751_p10 = scmp.ne.s32.totalorder %s2203_s4, %s1750_s17  ;;  %p1754_p11 = scmp.lt.u32.totalorder %s1750_s17, %s2203_s4 }
  0x39   :  { %p1756_p12 = pnand %p1754_p11, %p1751_p10 }
  0x3b   :  { %1759 = shalt.err (!%p1756_p12)
}
  0x3c   :  { %s1760_s23 = scalar_lea.vmem %s1878_s27, 1024  ;;  %p1765_p0 = scmp.lt.s32.totalorder %s1878_s27, %s1878_s27 }
  0x3d   :  { %p1761_p13 = scmp.ne.s32.totalorder %s1878_s27, %s1760_s23  ;;  %p1766_p1 = scmp.lt.s32.totalorder %s1760_s23, %s1760_s23 }
  0x3f   :  { %p1767_p2 = por %p1766_p1, %p1765_p0 }
  0x41   :  { %p1768_p3 = pnand %p1767_p2, %p1761_p13 }
  0x43   :  { %1771 = shalt.err (!%p1768_p3)
}
  0x44   :  { %64 = dma.hbm_to_vmem [thread:$0]  %s2203_s4, 1024, %s1878_s27, [#allocation10], %s1806_s1, %s1806_s1, %s1807_s21  }
  0x45   :  { %1794 = dma.done.wait [#allocation4], 1024  }
  0x46   :  { %1795 = vsyncadd [#allocation4], 4294966272 }
  0x47   :  { %1796 = dma.done.wait [#allocation7], 4096  }
  0x48   :  { %1797 = vsyncadd [#allocation7], 4294963200 }
  0x49   :  { %1798 = dma.done.wait [#allocation10], 1024  }
  0x4a   :  { %1799 = vsyncadd [#allocation10], 4294966272  ;;  %v1810_v0 = vmov 0.0   ;;  %v88_v1 = vld [vmem:[#allocation6 + $0x8] sm:$0xff]  ;;  %v90_v2 = vld [vmem:[#allocation6 + $0x18] sm:$0xff]  ;;  %vm115_vm0 = vcmask 523264   ;;  %v105_v63 = vlaneseq }
  0x4b   :  { %204 = vmatprep.mubr.f32.mxu1 %v1810_v0  ;;  %564 = vmatprep.mubr.f32.mxu0 %v1810_v0  ;;  %v87_v3 = vld [vmem:[#allocation6] sm:$0xff]  ;;  %v1385_v4 = vpack.c.bf16 %v90_v2, %v88_v1  ;;  %v89_v5 = vld [vmem:[#allocation6 + $0x10] sm:$0xff]  ;;  %v92_v6 = vld [vmem:[#allocation6 + $0x28] sm:$0xff]  ;;  %s1812_s26 = smov [#allocation11]  }
  0x4c   :  { %v94_v7 = vld [vmem:[#allocation6 + $0x38] sm:$0xff]  ;;  %v1387_v8 = vpack.c.bf16 %v89_v5, %v87_v3  ;;  %v91_v10 = vld [vmem:[#allocation6 + $0x20] sm:$0xff]  ;;  %v93_v11 = vld [vmem:[#allocation6 + $0x30] sm:$0xff]  ;;  %v106_v3 = vshrl.u32 %v105_v63, 7  ;;  %s1287_s27 = sshll.u32 %s1812_s26, 4  ;;  %s1288_s27 = int_to_ptr.vmem [resolvable:$true] %s1287_s27 }
  0x4d   :  { %v1389_v9 = vpack.c.bf16 %v94_v7, %v92_v6  ;;  %v96_v12 = vld [vmem:[#allocation6 + $0x48] sm:$0xff]  ;;  %1386 = vmatprep.subr.bf16.mxu1 %v1385_v4  ;;  %v98_v13 = vld [vmem:[#allocation6 + $0x58] sm:$0xff]  ;;  %v1391_v14 = vpack.c.bf16 %v93_v11, %v91_v10  ;;  %v95_v15 = vld [vmem:[#allocation6 + $0x40] sm:$0xff]  ;;  %p1777_p5 = scmp.lt.s32.totalorder %s1288_s27, %s1288_s27 }
  0x4e   :  { %1388 = vmatpush1.bf16.msra.mxu1 %v1387_v8  ;;  %v97_v16 = vld [vmem:[#allocation6 + $0x50] sm:$0xff]  ;;  %v1393_v17 = vpack.c.bf16 %v98_v13, %v96_v12  ;;  %v100_v18 = vld [vmem:[#allocation6 + $0x68] sm:$0xff]  ;;  %v102_v19 = vld [vmem:[#allocation6 + $0x78] sm:$0xff]  ;;  %v107_v6 = vsub.s32 0, %v106_v3  ;;  %v111_v8 = vsub.s32 1, %v106_v3 }
  0x4f   :  { %1390 = vmatprep.subr.bf16.mxu1 %v1389_v9  ;;  %v270_v20 = vld [vmem:[#allocation8 + $0x8] sm:$0xff]  ;;  %v272_v21 = vld [vmem:[#allocation8 + $0x18] sm:$0xff]  ;;  %v269_v22 = vld [vmem:[#allocation8] sm:$0xff]  ;;  %v1395_v26 = vpack.c.bf16 %v97_v16, %v95_v15  ;;  %v1397_v30 = vpack.c.bf16 %v102_v19, %v100_v18 }
  0x50   :  { %v271_v23 = vld [vmem:[#allocation8 + $0x10] sm:$0xff]  ;;  %v1917_v24 = vpack.c.bf16 %v272_v21, %v270_v20  ;;  %v274_v25 = vld [vmem:[#allocation8 + $0x28] sm:$0xff]  ;;  %v99_v27 = vld [vmem:[#allocation6 + $0x60] sm:$0xff] }
  0x51   :  { %v1919_v28 = vpack.c.bf16 %v271_v23, %v269_v22  ;;  %v276_v29 = vld [vmem:[#allocation8 + $0x38] sm:$0xff]  ;;  %v101_v31 = vld [vmem:[#allocation6 + $0x70] sm:$0xff]  ;;  %v273_v33 = vld [vmem:[#allocation8 + $0x20] sm:$0xff]  ;;  %v2009_v23 = vand.u32 127, %v105_v63 }
  0x52   :  { %1392 = vmatpush1.bf16.msra.mxu1 %v1391_v14  ;;  %v1921_v32 = vpack.c.bf16 %v276_v29, %v274_v25  ;;  %v275_v34 = vld [vmem:[#allocation8 + $0x30] sm:$0xff]  ;;  %1434 = vmatprep.subr.bf16.mxu0 %v1917_v24  ;;  %v278_v35 = vld [vmem:[#allocation8 + $0x48] sm:$0xff]  ;;  %v280_v36 = vld [vmem:[#allocation8 + $0x58] sm:$0xff]  ;;  %v1399_v37 = vpack.c.bf16 %v101_v31, %v99_v27 }
  0x53   :  { %1394 = vmatprep.subr.bf16.mxu1 %v1393_v17  ;;  %1436 = vmatpush1.bf16.msra.mxu0 %v1919_v28  ;;  %v1926_v38 = vpack.c.bf16 %v275_v34, %v273_v33  ;;  %v1928_v39 = vpack.c.bf16 %v280_v36, %v278_v35  ;;  %v277_v40 = vld [vmem:[#allocation8 + $0x40] sm:$0xff]  ;;  %v279_v41 = vld [vmem:[#allocation8 + $0x50] sm:$0xff]  ;;  %v282_v42 = vld [vmem:[#allocation8 + $0x68] sm:$0xff]  ;;  %vm287_vm1 = vcmp.lt.s32.totalorder %v2009_v23, 64  ;;  %vm288_vm2 = vcmp.lt.s32.totalorder %v2009_v23, 32 }
  0x54   :  { %1438 = vmatprep.subr.bf16.mxu0 %v1921_v32  ;;  %v284_v43 = vld [vmem:[#allocation8 + $0x78] sm:$0xff]  ;;  %v79_v44 = vld [vmem:[#allocation3] sm:$0xff]  ;;  %v1932_v45 = vpack.c.bf16 %v279_v41, %v277_v40  ;;  %v283_v48 = vld [vmem:[#allocation8 + $0x70] sm:$0xff] }
  0x55   :  { %v1935_v46 = vpack.c.bf16 %v284_v43, %v282_v42  ;;  %v281_v47 = vld [vmem:[#allocation8 + $0x60] sm:$0xff]  ;;  %v80_v49 = vld [vmem:[#allocation3 + $0x8] sm:$0xff]  ;;  %v81_v51 = vld [vmem:[#allocation3 + $0x10] sm:$0xff] }
  0x56   :  { %1396 = vmatpush1.bf16.msra.mxu1 %v1395_v26  ;;  %v1942_v50 = vpack.c.bf16 %v283_v48, %v281_v47  ;;  %v82_v52 = vld [vmem:[#allocation3 + $0x18] sm:$0xff]  ;;  %v83_v53 = vld [vmem:[#allocation3 + $0x20] sm:$0xff]  ;;  %v84_v54 = vld [vmem:[#allocation3 + $0x28] sm:$0xff] }
  0x57   :  { %1398 = vmatprep.subr.bf16.mxu1 %v1397_v30  ;;  %1440 = vmatpush1.bf16.msra.mxu0 %v1926_v38  ;;  %v85_v55 = vld [vmem:[#allocation3 + $0x30] sm:$0xff]  ;;  %v86_v56 = vld [vmem:[#allocation3 + $0x38] sm:$0xff]  ;;  %v103_v7 = vld [vmem:[%s2202_s3] sm:$0x3]  ;;  %s1811_s3 = smov 64  }
  0x58   :  { %1442 = vmatprep.subr.bf16.mxu0 %v1928_v39  ;;  %v2003_v11 = vrot.slane %v103_v7, %v107_v6  ;;  %v2005_v12 = vrot.slane %v103_v7, %v111_v8 }
  0x5a   :  { %1400 = vmatpush1.bf16.msra.mxu1 %v1399_v37 }
  0x5b   :  { %1402 = vmatprep.subr.bf16.mxu1 %v1917_v24  ;;  %1444 = vmatpush1.bf16.msra.mxu0 %v1932_v45 }
  0x5c   :  { %1446 = vmatprep.subr.bf16.mxu0 %v1935_v46 }
  0x5d   :  { %1301 = vmatmul.mubr.msk.f32.vlgmr.msra.gmra.mrb[0].mxu1 %vm115_vm0, %v79_v44 }
  0x5e   :  { %1404 = vmatpush1.bf16.msra.mxu1 %v1919_v28  ;;  %210 = vmatprep.mubr.f32.mxu1 %v1810_v0 }
  0x5f   :  { %1406 = vmatprep.subr.bf16.mxu1 %v1921_v32  ;;  %1448 = vmatpush1.bf16.msra.mxu0 %v1942_v50 }
  0x60   :  { %1450 = vmatprep.subr.bf16.mxu0 %v1917_v24 }
  0x61   :  { %1302 = vmatmul.mubr.msk.f32.gmra.mrb[2].mxu1 %vm115_vm0, %v80_v49 }
  0x62   :  { %216 = vmatprep.mubr.f32.mxu1 %v1810_v0  ;;  %1408 = vmatpush1.bf16.msra.mxu1 %v1926_v38 }
  0x63   :  { %1410 = vmatprep.subr.bf16.mxu1 %v1928_v39 }
  0x65   :  { %1303 = vmatmul.mubr.msk.f32.gmra.mrb[4].mxu1 %vm115_vm0, %v81_v51 }
  0x66   :  { %222 = vmatprep.mubr.f32.mxu1 %v1810_v0  ;;  %1412 = vmatpush1.bf16.msra.mxu1 %v1932_v45 }
  0x67   :  { %1414 = vmatprep.subr.bf16.mxu1 %v1935_v46 }
  0x69   :  { %1304 = vmatmul.mubr.msk.f32.gmra.mrb[6].mxu1 %vm115_vm0, %v82_v52 }
  0x6a   :  { %228 = vmatprep.mubr.f32.mxu1 %v1810_v0  ;;  %1416 = vmatpush1.bf16.msra.mxu1 %v1942_v50 }
  0x6b   :  { %1418 = vmatprep.subr.bf16.mxu1 %v1917_v24 }
  0x6d   :  { %1305 = vmatmul.mubr.msk.f32.gmra.mrb[8].mxu1 %vm115_vm0, %v83_v53 }
  0x6e   :  { %234 = vmatprep.mubr.f32.mxu1 %v1810_v0 }
  0x71   :  { %1306 = vmatmul.mubr.msk.f32.gmra.mrb[10].mxu1 %vm115_vm0, %v84_v54 }
  0x72   :  { %240 = vmatprep.mubr.f32.mxu1 %v1810_v0 }
  0x75   :  { %1307 = vmatmul.mubr.msk.f32.gmra.mrb[12].mxu1 %vm115_vm0, %v85_v55 }
  0x76   :  { %246 = vmatprep.mubr.f32.mxu1 %v1810_v0 }
  0x79   :  { %1308 = vmatmul.mubr.msk.f32.gmra.mrb[14].mxu1 %vm115_vm0, %v86_v56 }
  0x7a   :  { %358 = vmatprep.mubr.f32.mxu1 %v1810_v0 }
  0x7d   :  { %359 = vmatmul.mubr.f32.vlgmr.msra.gmra.mrb[0].mxu1 %v1810_v0 }
  0x7e   :  { %1420 = vmatpush1.bf16.msra.mxu1 %v1919_v28  ;;  %461 = vmatprep.mubr.f32.mxu1 %v1810_v0 }
  0x7f   :  { %1422 = vmatprep.subr.bf16.mxu1 %v1921_v32 }
  0x82   :  { %1424 = vmatpush1.bf16.msra.mxu1 %v1926_v38 }
  0x83   :  { %1426 = vmatprep.subr.bf16.mxu1 %v1928_v39 }
  0x86   :  { %1428 = vmatpush1.bf16.msra.mxu1 %v1932_v45 }
  0x87   :  { %1430 = vmatprep.subr.bf16.mxu1 %v1935_v46 }
  0x8a   :  { %1432 = vmatpush1.bf16.msra.mxu1 %v1942_v50 }
 0x138   :  { %v1976_v57 = vpop.f32.mrb[4].mxu1 }
 0x139   :  { %v1978_v58 = vpop.f32.mrb[5].mxu1 }
 0x13c   :  { %v1980_v59 = vpop.f32.mrb[6].mxu1 }
 0x13d   :  { %v1982_v60 = vpop.f32.mrb[7].mxu1 }
 0x140   :  { %v1984_v61 = vpop.f32.mrb[8].mxu1 }
 0x141   :  { %v1986_v62 = vpop.f32.mrb[9].mxu1 }
 0x144   :  { %v1988_v1 = vpop.f32.mrb[10].mxu1 }
 0x145   :  { %v1990_v2 = vpop.f32.mrb[11].mxu1 }
 0x148   :  { %v1992_v4 = vpop.f32.mrb[12].mxu1 }
 0x149   :  { %v1994_v5 = vpop.f32.mrb[13].mxu1 }
 0x14c   :  { %v1999_v9 = vpop.f32.mrb[14].mxu1 }
 0x14d   :  { %v2001_v10 = vpop.f32.mrb[15].mxu1 }
 0x150   :  { %v360_v13 = vpop.f32.mrb[0].mxu1 }
 0x151   :  { %v1545_v14 = vadd.f32 %v360_v13, %v2003_v11  ;;  %v362_v15 = vpop.f32.mrb[1].mxu1 }
 0x152   :  { %v1546_v16 = vadd.f32 %v362_v15, %v2005_v12  ;;  %v219_v15 = vadd.f32 %v1976_v57, %v2003_v11 }
 0x153   :  { %v1309_v17 = vmul.f32 -1.442695, %v1545_v14 }
 0x154   :  { %v1310_v18 = vmul.f32 -1.442695, %v1546_v16 }
 0x155   :  { %1588 = vpow2.f32 %v1309_v17 }
 0x156   :  { %1590 = vpow2.f32 %v1310_v18 }
 0x157   :  { %1592 = vtanh.f32 %v1546_v16  ;;  %v221_v16 = vadd.f32 %v1978_v58, %v2005_v12 }
 0x15f   :  { %v1589_v19 = vpop.eup %1588 }
 0x160   :  { %v1591_v20 = vpop.eup %1590  ;;  %v370_v21 = vadd.f32 1.0, %v1589_v19 }
 0x161   :  { %v377_v22 = vadd.f32 1.0, %v1591_v20  ;;  %v1593_v25 = vpop.eup %1592 }
 0x163   :  { %1594 = vrcp.f32 %v377_v22 }
 0x164   :  { %1596 = vrcp.f32 %v370_v21 }
 0x16d   :  { %v1595_v26 = vpop.eup %1594 }
 0x16e   :  { %v1597_v27 = vpop.eup %1596  ;;  %v380_v29 = vsel %vm287_vm1, %v1593_v25, %v1595_v26 }
 0x16f   :  { %v382_v30 = vmul.f32 %v1597_v27, %v380_v29  ;;  %v381_v31 = vmul.f32 0.0, %v1597_v27 }
 0x171   :  { %384 = vrot.lane.b32.xlu0 %v382_v30, %s1811_s3 }
 0x1e3   :  { %v385_v33 = vpop.permute.xlu0 %384 }
 0x1e4   :  { %v387_v34 = vadd.f32 %v385_v33, %v381_v31 }
 0x1e6   :  { %1598 = vtanh.f32 %v387_v34 }
 0x1f0   :  { %v1599_v35 = vpop.eup %1598 }
 0x1f1   :  { %v389_v36 = vmul.f32 %v1599_v35, %v380_v29 }
 0x1f3   :  { %393 = vrot.lane.b32.xlu0 %v389_v36, %s1811_s3 }
 0x265   :  { %v2016_v37 = vpop.permute.xlu0 %393 }
 0x266   :  { %1311 = vmatmul.mubr.msk.f32.vlgmr.msra.gmra.mrb[2].mxu1 %vm115_vm0, %v2016_v37 }
 0x339   :  { %v463_v40 = vpop.f32.mrb[2].mxu1 }
 0x33a   :  { %v1547_v41 = vadd.f32 %v463_v40, %v2003_v11  ;;  %v465_v42 = vpop.f32.mrb[3].mxu1 }
 0x33b   :  { %v1548_v43 = vadd.f32 %v465_v42, %v2005_v12 }
 0x33c   :  { %v1312_v44 = vmul.f32 -1.442695, %v1547_v41 }
 0x33d   :  { %v1313_v47 = vmul.f32 -1.442695, %v1548_v43 }
 0x33e   :  { %1600 = vpow2.f32 %v1312_v44  ;;  %v227_v44 = vadd.f32 %v1982_v60, %v2005_v12 }
 0x33f   :  { %1602 = vpow2.f32 %v1313_v47 }
 0x340   :  { %1604 = vtanh.f32 %v1548_v43  ;;  %v225_v43 = vadd.f32 %v1980_v59, %v2003_v11 }
 0x348   :  { %v1601_v48 = vpop.eup %1600 }
 0x349   :  { %v1603_v49 = vpop.eup %1602  ;;  %v473_v51 = vadd.f32 1.0, %v1601_v48 }
 0x34a   :  { %v480_v52 = vadd.f32 1.0, %v1603_v49  ;;  %v1605_v53 = vpop.eup %1604 }
 0x34c   :  { %1606 = vrcp.f32 %v480_v52 }
 0x34d   :  { %1608 = vrcp.f32 %v473_v51 }
 0x356   :  { %v1607_v54 = vpop.eup %1606 }
 0x357   :  { %v1609_v55 = vpop.eup %1608  ;;  %v483_v56 = vsel %vm287_vm1, %v1605_v53, %v1607_v54 }
 0x358   :  { %v485_v63 = vmul.f32 %v1609_v55, %v483_v56  ;;  %v484_v3 = vmul.f32 %v1609_v55, %v387_v34 }
 0x35a   :  { %487 = vrot.lane.b32.xlu1 %v485_v63, %s1811_s3 }
 0x3cc   :  { %v488_v6 = vpop.permute.xlu1 %487 }
 0x3cd   :  { %v490_v7 = vadd.f32 %v488_v6, %v484_v3 }
 0x3cf   :  { %1610 = vtanh.f32 %v490_v7 }
 0x3d9   :  { %v1611_v8 = vpop.eup %1610 }
 0x3da   :  { %v492_v13 = vmul.f32 %v1611_v8, %v483_v56 }
 0x3dc   :  { %496 = vrot.lane.b32.xlu1 %v492_v13, %s1811_s3 }
 0x44e   :  { %v2026_v14 = vpop.permute.xlu1 %496 }
 0x44f   :  { %1314 = vmatmul.mubr.msk.f32.vlgmr.msra.gmra.mrb[0].mxu0 %vm115_vm0, %v2026_v14 }
 0x450   :  { %1452 = vmatpush1.bf16.msra.mxu0 %v1919_v28  ;;  %667 = vmatprep.mubr.f32.mxu0 %v1810_v0 }
 0x451   :  { %1454 = vmatprep.subr.bf16.mxu0 %v1921_v32 }
 0x454   :  { %1456 = vmatpush1.bf16.msra.mxu0 %v1926_v38 }
 0x455   :  { %1458 = vmatprep.subr.bf16.mxu0 %v1928_v39 }
 0x458   :  { %1460 = vmatpush1.bf16.msra.mxu0 %v1932_v45 }
 0x459   :  { %1462 = vmatprep.subr.bf16.mxu0 %v1935_v46 }
 0x45c   :  { %1464 = vmatpush1.bf16.msra.mxu0 %v1942_v50 }
 0x45d   :  { %1466 = vmatprep.subr.bf16.mxu0 %v1917_v24 }
 0x522   :  { %v566_v17 = vpop.f32.mrb[0].mxu0 }
 0x523   :  { %v571_v18 = vadd.f32 %v566_v17, %v219_v15  ;;  %v568_v19 = vpop.f32.mrb[1].mxu0 }
 0x524   :  { %v572_v20 = vadd.f32 %v568_v19, %v221_v16  ;;  %v231_v19 = vadd.f32 %v1984_v61, %v2003_v11 }
 0x525   :  { %v1315_v21 = vmul.f32 -1.442695, %v571_v18 }
 0x526   :  { %v1316_v22 = vmul.f32 -1.442695, %v572_v20 }
 0x527   :  { %1612 = vpow2.f32 %v1315_v21 }
 0x528   :  { %1614 = vpow2.f32 %v1316_v22 }
 0x529   :  { %1616 = vtanh.f32 %v572_v20  ;;  %v233_v20 = vadd.f32 %v1986_v62, %v2005_v12 }
 0x531   :  { %v1613_v25 = vpop.eup %1612 }
 0x532   :  { %v1615_v26 = vpop.eup %1614  ;;  %v576_v27 = vadd.f32 1.0, %v1613_v25 }
 0x533   :  { %v583_v29 = vadd.f32 1.0, %v1615_v26  ;;  %v1617_v30 = vpop.eup %1616 }
 0x535   :  { %1618 = vrcp.f32 %v583_v29 }
 0x536   :  { %1620 = vrcp.f32 %v576_v27 }
 0x53f   :  { %v1619_v57 = vpop.eup %1618 }
 0x540   :  { %v1621_v31 = vpop.eup %1620  ;;  %v586_v58 = vsel %vm287_vm1, %v1617_v30, %v1619_v57 }
 0x541   :  { %v588_v33 = vmul.f32 %v1621_v31, %v586_v58  ;;  %v587_v34 = vmul.f32 %v1621_v31, %v490_v7 }
 0x543   :  { %590 = vrot.lane.b32.xlu0 %v588_v33, %s1811_s3 }
 0x5b5   :  { %v591_v35 = vpop.permute.xlu0 %590 }
 0x5b6   :  { %v593_v36 = vadd.f32 %v591_v35, %v587_v34 }
 0x5b8   :  { %1622 = vtanh.f32 %v593_v36 }
 0x5c2   :  { %v1623_v40 = vpop.eup %1622 }
 0x5c3   :  { %v595_v41 = vmul.f32 %v1623_v40, %v586_v58 }
 0x5c5   :  { %599 = vrot.lane.b32.xlu1 %v595_v41, %s1811_s3 }
 0x637   :  { %v2047_v42 = vpop.permute.xlu1 %599 }
 0x638   :  { %1317 = vmatmul.mubr.msk.f32.vlgmr.msra.gmra.mrb[2].mxu0 %vm115_vm0, %v2047_v42 }
 0x639   :  { %1468 = vmatpush1.bf16.msra.mxu0 %v1919_v28  ;;  %770 = vmatprep.mubr.f32.mxu0 %v1810_v0 }
 0x63a   :  { %1470 = vmatprep.subr.bf16.mxu0 %v1921_v32 }
 0x63d   :  { %1472 = vmatpush1.bf16.msra.mxu0 %v1926_v38 }
 0x63e   :  { %1474 = vmatprep.subr.bf16.mxu0 %v1928_v39 }
 0x641   :  { %1476 = vmatpush1.bf16.msra.mxu0 %v1932_v45 }
 0x642   :  { %1478 = vmatprep.subr.bf16.mxu0 %v1935_v46 }
 0x645   :  { %1480 = vmatpush1.bf16.msra.mxu0 %v1942_v50 }
 0x646   :  { %1482 = vmatprep.subr.bf16.mxu0 %v1917_v24 }
 0x70b   :  { %v669_v47 = vpop.f32.mrb[2].mxu0 }
 0x70c   :  { %v674_v48 = vadd.f32 %v669_v47, %v225_v43  ;;  %v671_v49 = vpop.f32.mrb[3].mxu0 }
 0x70d   :  { %v675_v51 = vadd.f32 %v671_v49, %v227_v44  ;;  %v239_v49 = vadd.f32 %v1990_v2, %v2005_v12 }
 0x70e   :  { %v1318_v52 = vmul.f32 -1.442695, %v674_v48  ;;  %v237_v48 = vadd.f32 %v1988_v1, %v2003_v11 }
 0x70f   :  { %v1319_v53 = vmul.f32 -1.442695, %v675_v51 }
 0x710   :  { %1624 = vpow2.f32 %v1318_v52 }
 0x711   :  { %1626 = vpow2.f32 %v1319_v53 }
 0x712   :  { %1628 = vtanh.f32 %v675_v51 }
 0x71a   :  { %v1625_v54 = vpop.eup %1624 }
 0x71b   :  { %v1627_v55 = vpop.eup %1626  ;;  %v679_v56 = vadd.f32 1.0, %v1625_v54 }
 0x71c   :  { %v686_v63 = vadd.f32 1.0, %v1627_v55  ;;  %v1629_v3 = vpop.eup %1628 }
 0x71e   :  { %1630 = vrcp.f32 %v686_v63 }
 0x71f   :  { %1632 = vrcp.f32 %v679_v56 }
 0x728   :  { %v1631_v59 = vpop.eup %1630 }
 0x729   :  { %v1633_v6 = vpop.eup %1632  ;;  %v689_v60 = vsel %vm287_vm1, %v1629_v3, %v1631_v59 }
 0x72a   :  { %v691_v7 = vmul.f32 %v1633_v6, %v689_v60  ;;  %v690_v8 = vmul.f32 %v1633_v6, %v593_v36 }
 0x72c   :  { %693 = vrot.lane.b32.xlu0 %v691_v7, %s1811_s3 }
 0x79e   :  { %v694_v13 = vpop.permute.xlu0 %693 }
 0x79f   :  { %v696_v15 = vadd.f32 %v694_v13, %v690_v8 }
 0x7a1   :  { %1634 = vtanh.f32 %v696_v15 }
 0x7ab   :  { %v1635_v16 = vpop.eup %1634 }
 0x7ac   :  { %v698_v17 = vmul.f32 %v1635_v16, %v689_v60 }
 0x7ae   :  { %702 = vrot.lane.b32.xlu1 %v698_v17, %s1811_s3 }
 0x820   :  { %v2068_v18 = vpop.permute.xlu1 %702 }
 0x821   :  { %1320 = vmatmul.mubr.msk.f32.vlgmr.msra.gmra.mrb[4].mxu0 %vm115_vm0, %v2068_v18 }
 0x822   :  { %1484 = vmatpush1.bf16.msra.mxu0 %v1919_v28  ;;  %873 = vmatprep.mubr.f32.mxu0 %v1810_v0 }
 0x823   :  { %1486 = vmatprep.subr.bf16.mxu0 %v1921_v32 }
 0x826   :  { %1488 = vmatpush1.bf16.msra.mxu0 %v1926_v38 }
 0x827   :  { %1490 = vmatprep.subr.bf16.mxu0 %v1928_v39 }
 0x82a   :  { %1492 = vmatpush1.bf16.msra.mxu0 %v1932_v45 }
 0x82b   :  { %1494 = vmatprep.subr.bf16.mxu0 %v1935_v46 }
 0x82e   :  { %1496 = vmatpush1.bf16.msra.mxu0 %v1942_v50 }
 0x82f   :  { %1498 = vmatprep.subr.bf16.mxu0 %v1917_v24 }
 0x8f4   :  { %v772_v21 = vpop.f32.mrb[4].mxu0 }
 0x8f5   :  { %v777_v22 = vadd.f32 %v772_v21, %v231_v19  ;;  %v774_v25 = vpop.f32.mrb[5].mxu0 }
 0x8f6   :  { %v778_v26 = vadd.f32 %v774_v25, %v233_v20  ;;  %v243_v20 = vadd.f32 %v1992_v4, %v2003_v11 }
 0x8f7   :  { %v1321_v27 = vmul.f32 -1.442695, %v777_v22 }
 0x8f8   :  { %v1322_v29 = vmul.f32 -1.442695, %v778_v26 }
 0x8f9   :  { %1636 = vpow2.f32 %v1321_v27 }
 0x8fa   :  { %1638 = vpow2.f32 %v1322_v29 }
 0x8fb   :  { %1640 = vtanh.f32 %v778_v26 }
 0x903   :  { %v1637_v30 = vpop.eup %1636 }
 0x904   :  { %v1639_v57 = vpop.eup %1638  ;;  %v782_v31 = vadd.f32 1.0, %v1637_v30 }
 0x905   :  { %v789_v58 = vadd.f32 1.0, %v1639_v57  ;;  %v1641_v33 = vpop.eup %1640 }
 0x907   :  { %1642 = vrcp.f32 %v789_v58 }
 0x908   :  { %1644 = vrcp.f32 %v782_v31 }
 0x911   :  { %v1643_v61 = vpop.eup %1642 }
 0x912   :  { %v1645_v34 = vpop.eup %1644  ;;  %v792_v62 = vsel %vm287_vm1, %v1641_v33, %v1643_v61 }
 0x913   :  { %v794_v35 = vmul.f32 %v1645_v34, %v792_v62  ;;  %v793_v36 = vmul.f32 %v1645_v34, %v696_v15  ;;  %v249_v34 = vadd.f32 %v1999_v9, %v2003_v11 }
 0x915   :  { %796 = vrot.lane.b32.xlu0 %v794_v35, %s1811_s3 }
 0x987   :  { %v797_v40 = vpop.permute.xlu0 %796 }
 0x988   :  { %v799_v41 = vadd.f32 %v797_v40, %v793_v36 }
 0x98a   :  { %1646 = vtanh.f32 %v799_v41 }
 0x994   :  { %v1647_v43 = vpop.eup %1646 }
 0x995   :  { %v801_v44 = vmul.f32 %v1647_v43, %v792_v62  ;;  %v251_v62 = vadd.f32 %v2001_v10, %v2005_v12 }
 0x997   :  { %805 = vrot.lane.b32.xlu1 %v801_v44, %s1811_s3 }
 0xa09   :  { %v2089_v47 = vpop.permute.xlu1 %805 }
 0xa0a   :  { %1323 = vmatmul.mubr.msk.f32.vlgmr.msra.gmra.mrb[6].mxu0 %vm115_vm0, %v2089_v47 }
 0xa0b   :  { %1500 = vmatpush1.bf16.msra.mxu0 %v1919_v28  ;;  %976 = vmatprep.mubr.f32.mxu0 %v1810_v0 }
 0xa0c   :  { %1502 = vmatprep.subr.bf16.mxu0 %v1921_v32 }
 0xa0f   :  { %1504 = vmatpush1.bf16.msra.mxu0 %v1926_v38 }
 0xa10   :  { %1506 = vmatprep.subr.bf16.mxu0 %v1928_v39 }
 0xa13   :  { %1508 = vmatpush1.bf16.msra.mxu0 %v1932_v45 }
 0xa14   :  { %1510 = vmatprep.subr.bf16.mxu0 %v1935_v46 }
 0xa17   :  { %1512 = vmatpush1.bf16.msra.mxu0 %v1942_v50 }
 0xa18   :  { %1514 = vmatprep.subr.bf16.mxu0 %v1917_v24 }
 0xadd   :  { %v875_v51 = vpop.f32.mrb[6].mxu0 }
 0xade   :  { %v880_v52 = vadd.f32 %v875_v51, %v237_v48  ;;  %v877_v53 = vpop.f32.mrb[7].mxu0 }
 0xadf   :  { %v881_v54 = vadd.f32 %v877_v53, %v239_v49 }
 0xae0   :  { %v1324_v55 = vmul.f32 -1.442695, %v880_v52 }
 0xae1   :  { %v1325_v56 = vmul.f32 -1.442695, %v881_v54 }
 0xae2   :  { %1648 = vpow2.f32 %v1324_v55  ;;  %v1131_v55 = vld [vmem:[#allocation9 + $0x8] sm:$0xff] }
 0xae3   :  { %1650 = vpow2.f32 %v1325_v56  ;;  %v1132_v56 = vld [vmem:[#allocation9 + $0x10] sm:$0xff] }
 0xae4   :  { %1652 = vtanh.f32 %v881_v54  ;;  %v1130_v54 = vld [vmem:[#allocation9] sm:$0xff] }
 0xaec   :  { %v1649_v63 = vpop.eup %1648 }
 0xaed   :  { %v1651_v3 = vpop.eup %1650  ;;  %v885_v59 = vadd.f32 1.0, %v1649_v63  ;;  %v1529_v63 = vpack.c.bf16 %v1131_v55, %v1130_v54 }
 0xaee   :  { %v892_v6 = vadd.f32 1.0, %v1651_v3  ;;  %v1653_v24 = vpop.eup %1652  ;;  %v1133_v3 = vld [vmem:[#allocation9 + $0x18] sm:$0xff] }
 0xaef   :  { %1530 = vmatprep.subr.bf16.mxu1 %v1529_v63 }
 0xaf0   :  { %1654 = vrcp.f32 %v892_v6  ;;  %v1134_v6 = vld [vmem:[#allocation9 + $0x20] sm:$0xff]  ;;  %1532 = vmatpush3.bf16.msra.mxu1 %v1529_v63 }
 0xaf1   :  { %1656 = vrcp.f32 %v885_v59  ;;  %v1533_v59 = vpack.c.bf16 %v1133_v3, %v1132_v56 }
 0xaf3   :  { %1534 = vmatprep.subr.bf16.mxu1 %v1533_v59 }
 0xaf4   :  { %1536 = vmatpush3.bf16.msra.mxu1 %v1533_v59 }
 0xafa   :  { %v1655_v1 = vpop.eup %1654 }
 0xafb   :  { %v1657_v60 = vpop.eup %1656  ;;  %v895_v2 = vsel %vm287_vm1, %v1653_v24, %v1655_v1  ;;  %v1135_v24 = vld [vmem:[#allocation9 + $0x28] sm:$0xff] }
 0xafc   :  { %v897_v7 = vmul.f32 %v1657_v60, %v895_v2  ;;  %v896_v8 = vmul.f32 %v1657_v60, %v799_v41  ;;  %v1537_v1 = vpack.c.bf16 %v1135_v24, %v1134_v6  ;;  %v1136_v60 = vld [vmem:[#allocation9 + $0x30] sm:$0xff] }
 0xafe   :  { %899 = vrot.lane.b32.xlu0 %v897_v7, %s1811_s3  ;;  %1538 = vmatprep.subr.bf16.mxu1 %v1537_v1 }
 0xaff   :  { %1540 = vmatpush3.bf16.msra.mxu1 %v1537_v1 }
 0xb70   :  { %v900_v13 = vpop.permute.xlu0 %899 }
 0xb71   :  { %v902_v15 = vadd.f32 %v900_v13, %v896_v8 }
 0xb73   :  { %1658 = vtanh.f32 %v902_v15 }
 0xb7d   :  { %v1659_v16 = vpop.eup %1658 }
 0xb7e   :  { %v904_v17 = vmul.f32 %v1659_v16, %v895_v2  ;;  %v1137_v2 = vld [vmem:[#allocation9 + $0x38] sm:$0xff] }
 0xb7f   :  { %v1541_v7 = vpack.c.bf16 %v1137_v2, %v1136_v60 }
 0xb80   :  { %908 = vrot.lane.b32.xlu1 %v904_v17, %s1811_s3 }
 0xb81   :  { %1542 = vmatprep.subr.bf16.mxu1 %v1541_v7 }
 0xb82   :  { %1544 = vmatpush3.bf16.msra.mxu1 %v1541_v7 }
 0xbf2   :  { %v2110_v19 = vpop.permute.xlu1 %908 }
 0xbf3   :  { %1326 = vmatmul.mubr.msk.f32.vlgmr.msra.gmra.mrb[8].mxu0 %vm115_vm0, %v2110_v19 }
 0xbf4   :  { %1516 = vmatpush1.bf16.msra.mxu0 %v1919_v28  ;;  %1079 = vmatprep.mubr.f32.mxu0 %v1810_v0  ;;  %v245_v28 = vadd.f32 %v1994_v5, %v2005_v12 }
 0xbf5   :  { %1518 = vmatprep.subr.bf16.mxu0 %v1921_v32 }
 0xbf8   :  { %1520 = vmatpush1.bf16.msra.mxu0 %v1926_v38 }
 0xbf9   :  { %1522 = vmatprep.subr.bf16.mxu0 %v1928_v39 }
 0xbfc   :  { %1524 = vmatpush1.bf16.msra.mxu0 %v1932_v45 }
 0xbfd   :  { %1526 = vmatprep.subr.bf16.mxu0 %v1935_v46 }
 0xc00   :  { %1528 = vmatpush1.bf16.msra.mxu0 %v1942_v50 }
 0xcc6   :  { %v978_v21 = vpop.f32.mrb[8].mxu0 }
 0xcc7   :  { %v983_v0 = vadd.f32 %v978_v21, %v243_v20  ;;  %v980_v22 = vpop.f32.mrb[9].mxu0 }
 0xcc8   :  { %v984_v32 = vadd.f32 %v980_v22, %v245_v28  ;;  %v1125_v22 = vsel %vm288_vm2, %v2068_v18, %v2089_v47 }
 0xcc9   :  { %v1327_v25 = vmul.f32 -1.442695, %v983_v0  ;;  %v1122_v0 = vsel %vm288_vm2, %v2047_v42, %v2110_v19 }
 0xcca   :  { %v1328_v38 = vmul.f32 -1.442695, %v984_v32 }
 0xccb   :  { %1660 = vpow2.f32 %v1327_v25  ;;  %v1127_v25 = vsel %vm288_vm2, %v2110_v19, %v2047_v42 }
 0xccc   :  { %1662 = vpow2.f32 %v1328_v38 }
 0xccd   :  { %1664 = vtanh.f32 %v984_v32  ;;  %v1126_v32 = vsel %vm288_vm2, %v2089_v47, %v2068_v18  ;;  %v1332_v47 = vld [vmem:[%s2204_s5] ss:$0 sm:$0xff]  ;;  %s1772_s5 = scalar_lea.vmem %s1288_s27, 1024 }
 0xcce   :  { %p1773_p4 = scmp.ne.s32.totalorder %s1288_s27, %s1772_s5  ;;  %p1778_p6 = scmp.lt.s32.totalorder %s1772_s5, %s1772_s5 }
 0xcd0   :  { %p1779_p7 = por %p1778_p6, %p1777_p5 }
 0xcd2   :  { %p1780_p8 = pnand %p1779_p7, %p1773_p4 }
 0xcd5   :  { %v1661_v39 = vpop.eup %1660 }
 0xcd6   :  { %v1663_v45 = vpop.eup %1662  ;;  %v988_v26 = vadd.f32 1.0, %v1661_v39 }
 0xcd7   :  { %v995_v46 = vadd.f32 1.0, %v1663_v45  ;;  %v1665_v50 = vpop.eup %1664 }
 0xcd9   :  { %1666 = vrcp.f32 %v995_v46 }
 0xcda   :  { %1668 = vrcp.f32 %v988_v26 }
 0xce3   :  { %v1667_v4 = vpop.eup %1666 }
 0xce4   :  { %v1669_v27 = vpop.eup %1668  ;;  %v998_v5 = vsel %vm287_vm1, %v1665_v50, %v1667_v4 }
 0xce5   :  { %v1000_v29 = vmul.f32 %v1669_v27, %v998_v5  ;;  %v999_v30 = vmul.f32 %v1669_v27, %v902_v15 }
 0xce7   :  { %1002 = vrot.lane.b32.xlu0 %v1000_v29, %s1811_s3 }
 0xd59   :  { %v1003_v57 = vpop.permute.xlu0 %1002 }
 0xd5a   :  { %v1005_v31 = vadd.f32 %v1003_v57, %v999_v30 }
 0xd5c   :  { %1670 = vtanh.f32 %v1005_v31 }
 0xd66   :  { %v1671_v58 = vpop.eup %1670 }
 0xd67   :  { %v1007_v33 = vmul.f32 %v1671_v58, %v998_v5 }
 0xd69   :  { %1011 = vrot.lane.b32.xlu1 %v1007_v33, %s1811_s3 }
 0xddb   :  { %v2130_v61 = vpop.permute.xlu1 %1011 }
 0xddc   :  { %1329 = vmatmul.mubr.msk.f32.vlgmr.msra.gmra.mrb[10].mxu0 %vm115_vm0, %v2130_v61  ;;  %v1119_v21 = vsel %vm288_vm2, %v2026_v14, %v2130_v61  ;;  %v1128_v38 = vsel %vm288_vm2, %v2130_v61, %v2026_v14 }
 0xeaf   :  { %v1081_v35 = vpop.f32.mrb[10].mxu0 }
 0xeb0   :  { %v1086_v36 = vadd.f32 %v1081_v35, %v249_v34  ;;  %v1083_v40 = vpop.f32.mrb[11].mxu0 }
 0xeb1   :  { %v1087_v41 = vadd.f32 %v1083_v40, %v251_v62 }
 0xeb2   :  { %v1330_v43 = vmul.f32 -1.442695, %v1086_v36 }
 0xeb3   :  { %v1331_v44 = vmul.f32 -1.442695, %v1087_v41 }
 0xeb4   :  { %1672 = vpow2.f32 %v1330_v43 }
 0xeb5   :  { %1674 = vpow2.f32 %v1331_v44 }
 0xeb6   :  { %1676 = vtanh.f32 %v1087_v41 }
 0xebe   :  { %v1673_v48 = vpop.eup %1672 }
 0xebf   :  { %v1675_v49 = vpop.eup %1674  ;;  %v1091_v51 = vadd.f32 1.0, %v1673_v48 }
 0xec0   :  { %v1098_v52 = vadd.f32 1.0, %v1675_v49  ;;  %v1677_v53 = vpop.eup %1676 }
 0xec2   :  { %1678 = vrcp.f32 %v1098_v52 }
 0xec3   :  { %1680 = vrcp.f32 %v1091_v51 }
 0xecc   :  { %v1679_v9 = vpop.eup %1678 }
 0xecd   :  { %v1681_v11 = vpop.eup %1680  ;;  %v1101_v10 = vsel %vm287_vm1, %v1677_v53, %v1679_v9 }
 0xece   :  { %v1103_v12 = vmul.f32 %v1681_v11, %v1101_v10  ;;  %v1102_v8 = vmul.f32 %v1681_v11, %v1005_v31 }
 0xed0   :  { %1105 = vrot.lane.b32.xlu0 %v1103_v12, %s1811_s3 }
 0xf42   :  { %v1106_v13 = vpop.permute.xlu0 %1105 }
 0xf43   :  { %v1108_v15 = vadd.f32 %v1106_v13, %v1102_v8 }
 0xf45   :  { %1682 = vtanh.f32 %v1108_v15 }
 0xf4f   :  { %v1683_v16 = vpop.eup %1682 }
 0xf50   :  { %v1110_v17 = vmul.f32 %v1683_v16, %v1101_v10 }
 0xf52   :  { %1113 = vrot.lane.b32.xlu1 %v1110_v17, %s1811_s3 }
 0xfc4   :  { %v1114_v20 = vpop.permute.xlu1 %1113 }
 0xfc5   :  { %v1116_v28 = vsel %vm288_vm2, %v2016_v37, %v1114_v20  ;;  %v1129_v18 = vsel %vm288_vm2, %v1114_v20, %v2016_v37 }
 0xfc6   :  { %1373 = vmatprep.mubr.msk.f32.mxu1 %vm115_vm0, %v1116_v28 }
 0xfc7   :  { %1374 = vmatmul.mubr.msk.f32.vlgmr.msra.gmra.mrb[16].mxu1 %vm115_vm0, %v1119_v21 }
 0xfc8   :  { %1376 = vmatprep.mubr.msk.f32.mxu1 %vm115_vm0, %v1122_v0 }
 0xfcb   :  { %1377 = vmatmul.mubr.msk.f32.gmra.mrb[18].mxu1 %vm115_vm0, %v1125_v22 }
 0xfcc   :  { %1379 = vmatprep.mubr.msk.f32.mxu1 %vm115_vm0, %v1126_v32 }
 0xfcf   :  { %1380 = vmatmul.mubr.msk.f32.gmra.mrb[20].mxu1 %vm115_vm0, %v1127_v25 }
 0xfd0   :  { %1382 = vmatprep.mubr.msk.f32.mxu1 %vm115_vm0, %v1128_v38 }
 0xfd3   :  { %1383 = vmatmul.mubr.msk.f32.gmra.mrb[22].mxu1 %vm115_vm0, %v1129_v18 }
0x109a   :  { %v1375_v42 = vpop.f32.mrb[16].mxu1 }
0x109b   :  { %v1241_v19 = vadd.f32 %v1375_v42, %v1332_v47  ;;  %v1235_v39 = vpop.f32.mrb[17].mxu1 }
0x109c   :  { %v1236_v45 = vadd.f32 %v1332_v47, %v1235_v39 }
0x109d   :  { %1275 = vst [vmem:[#allocation11 + $0x8] sm:$0xff] %v1241_v19 }
0x109e   :  { %1274 = vst [vmem:[#allocation11] sm:$0xff] %v1236_v45  ;;  %v1378_v26 = vpop.f32.mrb[18].mxu1 }
0x109f   :  { %v1251_v14 = vadd.f32 %v1378_v26, %v1332_v47  ;;  %v1245_v46 = vpop.f32.mrb[19].mxu1 }
0x10a0   :  { %v1246_v50 = vadd.f32 %v1332_v47, %v1245_v46 }
0x10a1   :  { %1277 = vst [vmem:[#allocation11 + $0x18] sm:$0xff] %v1251_v14 }
0x10a2   :  { %1276 = vst [vmem:[#allocation11 + $0x10] sm:$0xff] %v1246_v50  ;;  %v1381_v23 = vpop.f32.mrb[20].mxu1 }
0x10a3   :  { %v1261_v37 = vadd.f32 %v1381_v23, %v1332_v47  ;;  %v1255_v4 = vpop.f32.mrb[21].mxu1 }
0x10a4   :  { %v1256_v27 = vadd.f32 %v1332_v47, %v1255_v4 }
0x10a5   :  { %1279 = vst [vmem:[#allocation11 + $0x28] sm:$0xff] %v1261_v37 }
0x10a6   :  { %1278 = vst [vmem:[#allocation11 + $0x20] sm:$0xff] %v1256_v27  ;;  %v1384_v5 = vpop.f32.mrb[22].mxu1 }
0x10a7   :  { %v1271_v29 = vadd.f32 %v1384_v5, %v1332_v47  ;;  %v1265_v30 = vpop.f32.mrb[23].mxu1 }
0x10a8   :  { %v1266_v57 = vadd.f32 %v1332_v47, %v1265_v30 }
0x10a9   :  { %1281 = vst [vmem:[#allocation11 + $0x38] sm:$0xff] %v1271_v29 }
0x10aa   :  { %1280 = vst [vmem:[#allocation11 + $0x30] sm:$0xff] %v1266_v57 }
0x10ab   :  { %1783 = shalt.err (!%p1780_p8)
}
0x10ac   :  { %s1784_s30 = scalar_lea.hbm %s2205_s6, 1024 }
0x10ad   :  { %p1785_p9 = scmp.ne.s32.totalorder %s2205_s6, %s1784_s30  ;;  %p1788_p10 = scmp.lt.u32.totalorder %s1784_s30, %s2205_s6 }
0x10af   :  { %p1790_p11 = pnand %p1788_p10, %p1785_p9 }
0x10b1   :  { %1793 = shalt.err (!%p1790_p11)
}
0x10b2   :  { %1293 = dma.vmem_to_hbm [thread:$0]  %s1288_s27, 1024, %s2205_s6, [#allocation5], %s1806_s1, %s1806_s1, %s1807_s21  }
0x10b3   :  { %1800 = dma.done.wait [#allocation5], 1024  }
0x10b4   :  { %1801 = vsyncadd [#allocation5], 4294966272 }
0x10b5   :  { %1297 = vsyncpa [#allocation4], 1 }
0x10b6   :  { %1298 = vsyncpa [#allocation7], 1 }
0x10b7   :  { %1299 = vsyncpa [#allocation10], 1 }
0x10b8   :  { %1300 = vsyncpa [#allocation5], 1 }

</bundles_post_ra>
